<compile_context>
chip_gen: v5e
topology: v5e:2x2
jax: 0.10.0
libtpu: 0.0.40
codegen_flags: <defaults>
</compile_context>

<pallas_src>
import jax
import jax.numpy as jnp
from jax.experimental import pallas as pl
from jax.experimental.pallas import tpu as pltpu


def _round_up(n, m):
    return ((n + m - 1) // m) * m


def mlp_kernel(x_ref, w1_ref, b1_ref, w2_ref, b2_ref, o_ref):
    # Cast x to the weight dtype (bf16) in-kernel -> native MXU path; f32 acc.
    x = x_ref[...].astype(w1_ref.dtype)
    h = jnp.dot(x, w1_ref[...], preferred_element_type=jnp.float32)
    h = jnp.maximum(h + b1_ref[...], 0.0)                 # bias + ReLU on the VALU
    y = jnp.dot(h.astype(w2_ref.dtype), w2_ref[...],
                preferred_element_type=jnp.float32)
    o_ref[...] = (y + b2_ref[...]).astype(o_ref.dtype)


def pack_params(w1, b1, w2, b2, dtype=jnp.bfloat16):
    """Pack weights (done once): bf16 weights, zero-pad W2/b2 to a lane-dense width.

    w1: [feature_dim, hidden], b1: [hidden], w2: [hidden, action_dim], b2: [action_dim]
    """
    feature_dim, hidden = w1.shape
    action_dim = w2.shape[1]
    n_pad = _round_up(max(action_dim, 128), 128)           # lane-dense output width

    w1_p = w1.astype(dtype)                                # [feature_dim, hidden]
    w2_p = jnp.zeros((hidden, n_pad), dtype)
    w2_p = w2_p.at[:, :action_dim].set(w2.astype(dtype))
    b1_p = b1.reshape(1, hidden).astype(jnp.float32)       # broadcast rows, f32
    b2_p = jnp.zeros((1, n_pad), jnp.float32)
    b2_p = b2_p.at[0, :action_dim].set(b2.reshape(-1).astype(jnp.float32))
    return w1_p, b1_p, w2_p, b2_p, action_dim


def cart_model_forward(x, packed, *, batch_block=1024):
    """Fused CartModel forward. `packed` comes from pack_params()."""
    w1_p, b1_p, w2_p, b2_p, action_dim = packed
    batch, feature_dim = x.shape
    hidden = w1_p.shape[1]
    n_pad = w2_p.shape[1]
    xbytes = jnp.dtype(x.dtype).itemsize
    wbytes = jnp.dtype(w1_p.dtype).itemsize

    def cost(rows):
        return pl.CostEstimate(
            flops=2 * rows * (feature_dim * hidden + hidden * n_pad),
            transcendentals=0,
            bytes_accessed=(xbytes * rows * feature_dim
                            + wbytes * (feature_dim * hidden + hidden * n_pad)
                            + 4 * (hidden + n_pad)
                            + 4 * rows * n_pad))

    if batch <= batch_block:
        # Small-batch path: no grid, every operand fully resident in VMEM.
        out = pl.pallas_call(
            mlp_kernel,
            out_shape=jax.ShapeDtypeStruct((batch, n_pad), jnp.float32),
            in_specs=[pl.BlockSpec(memory_space=pltpu.MemorySpace.VMEM)] * 5,
            out_specs=pl.BlockSpec(memory_space=pltpu.MemorySpace.VMEM),
            cost_estimate=cost(batch),
        )(x, w1_p, b1_p, w2_p, b2_p)
        return out[:, :action_dim]

    # Large-batch path: tile the batch axis. Pick the tile so the grid has an
    # EVEN number of steps (splits evenly across v7x's two TCs) while keeping
    # the tile as large as allowed (fewer ~0.35 us grid-step overheads).
    steps = pl.cdiv(batch, batch_block)
    if steps % 2 == 1:
        steps += 1
    bb = _round_up(pl.cdiv(batch, steps), 8)               # sublane-aligned tile
    steps = pl.cdiv(batch, bb)
    if steps % 2 == 1:
        steps += 1
    padded_batch = steps * bb
    if padded_batch != batch:
        x = jnp.pad(x, ((0, padded_batch - batch), (0, 0)))

    out = pl.pallas_call(
        mlp_kernel,
        out_shape=jax.ShapeDtypeStruct((padded_batch, n_pad), jnp.float32),
        grid=(steps,),
        in_specs=[
            pl.BlockSpec((bb, feature_dim), lambda i: (i, 0)),
            pl.BlockSpec((feature_dim, hidden), lambda i: (0, 0)),   # resident
            pl.BlockSpec((1, hidden), lambda i: (0, 0)),             # resident
            pl.BlockSpec((hidden, n_pad), lambda i: (0, 0)),         # resident
            pl.BlockSpec((1, n_pad), lambda i: (0, 0)),              # resident
        ],
        out_specs=pl.BlockSpec((bb, n_pad), lambda i: (i, 0)),
        compiler_params=pltpu.CompilerParams(
            dimension_semantics=("parallel",)),
        cost_estimate=cost(padded_batch),
    )(x, w1_p, b1_p, w2_p, b2_p)
    return out[:batch, :action_dim]


def init_params(key, feature_dim, hidden_dim, action_dim, dtype=jnp.float32):
    """Deterministic synthetic params (PyTorch-style fan-in uniform), [in, out] layout."""
    k1, k2, k3, k4 = jax.random.split(key, 4)
    bound1 = 1.0 / (feature_dim ** 0.5)
    bound2 = 1.0 / (hidden_dim ** 0.5)
    w1 = jax.random.uniform(k1, (feature_dim, hidden_dim), dtype, -bound1, bound1)
    b1 = jax.random.uniform(k2, (hidden_dim,), dtype, -bound1, bound1)
    w2 = jax.random.uniform(k3, (hidden_dim, action_dim), dtype, -bound2, bound2)
    b2 = jax.random.uniform(k4, (action_dim,), dtype, -bound2, bound2)
    return w1, b1, w2, b2


if __name__ == "__main__":
    batch, feature_dim, hidden_dim, action_dim = 8, 32, 128, 8

    key = jax.random.PRNGKey(0)
    kx, kb, kp = jax.random.split(key, 3)
    x = jax.random.normal(kx, (batch, feature_dim), jnp.float32)
    w1, b1, w2, b2 = init_params(kp, feature_dim, hidden_dim, action_dim)

    # Reference that mirrors the kernel's numerics (bf16 weights, f32 accumulate).
    def ref_bf16(xv):
        h = jnp.dot(xv.astype(jnp.bfloat16), w1.astype(jnp.bfloat16),
                    preferred_element_type=jnp.float32) + b1
        h = jnp.maximum(h, 0.0)
        return jnp.dot(h.astype(jnp.bfloat16), w2.astype(jnp.bfloat16),
                       preferred_element_type=jnp.float32) + b2

    # --- bf16-weight small-batch (gridless) path ---
    packed = pack_params(w1, b1, w2, b2)                       # bf16 weights
    out = jax.block_until_ready(cart_model_forward(x, packed))
    assert out.shape == (batch, action_dim)
    assert jnp.allclose(out, ref_bf16(x), atol=2e-3, rtol=2e-3)

    # --- bf16-weight large-batch (batch-tiled, even parallel grid), ragged batch ---
    big = 519
    xb = jax.random.normal(kb, (big, feature_dim), jnp.float32)
    outb = jax.block_until_ready(cart_model_forward(xb, packed, batch_block=256))
    assert outb.shape == (big, action_dim)
    assert jnp.allclose(outb, ref_bf16(xb), atol=2e-3, rtol=2e-3)

    # --- f32-weight path: exact match against the PyTorch-style f32 reference ---
    packed_f32 = pack_params(w1, b1, w2, b2, dtype=jnp.float32)
    out32 = jax.block_until_ready(cart_model_forward(x, packed_f32))
    ref32 = jnp.maximum(x @ w1 + b1, 0.0) @ w2 + b2
    assert out32.shape == (batch, action_dim)
    assert jnp.allclose(out32, ref32, atol=1e-4, rtol=1e-4)

    print("KERNEL_OK")
</pallas_src>

<mosaic_0001>
module attributes {stable_mosaic.version = 11 : i64} {
  func.func @mlp_kernel(%arg0: memref<8x32xf32, #tpu.memory_space<vmem>>, %arg1: memref<32x128xbf16, #tpu.memory_space<vmem>>, %arg2: memref<1x128xf32, #tpu.memory_space<vmem>>, %arg3: memref<128x128xbf16, #tpu.memory_space<vmem>>, %arg4: memref<1x128xf32, #tpu.memory_space<vmem>>, %arg5: memref<8x128xf32, #tpu.memory_space<vmem>>) attributes {dimension_semantics = [], scalar_prefetch = 0 : i64, scratch_operands = 0 : i64, tpu.core_type = #tpu.core_type<tc>} {
    %c0 = arith.constant 0 : index
    %c0_0 = arith.constant 0 : index
    %0 = vector.load %arg0[%c0, %c0_0] : memref<8x32xf32, #tpu.memory_space<vmem>>, vector<8x32xf32>
    %1 = arith.truncf %0 : vector<8x32xf32> to vector<8x32xbf16>
    %c0_1 = arith.constant 0 : index
    %c0_2 = arith.constant 0 : index
    %2 = vector.load %arg1[%c0_1, %c0_2] : memref<32x128xbf16, #tpu.memory_space<vmem>>, vector<32x128xbf16>
    %cst = arith.constant dense<0.000000e+00> : vector<8x128xf32>
    %3 = tpu.matmul %1, %2, %cst {dimension_numbers = #tpu.dot_dimension_numbers<[1], [0], [0], [1], [0, 0, 1, 1], [], []>} : vector<8x32xbf16>, vector<32x128xbf16>, vector<8x128xf32> -> vector<8x128xf32>
    %c0_3 = arith.constant 0 : index
    %c0_4 = arith.constant 0 : index
    %4 = vector.load %arg2[%c0_3, %c0_4] : memref<1x128xf32, #tpu.memory_space<vmem>>, vector<1x128xf32>
    %5 = vector.broadcast %4 : vector<1x128xf32> to vector<8x128xf32>
    %6 = arith.addf %3, %5 : vector<8x128xf32>
    %cst_5 = arith.constant 0.000000e+00 : f32
    %7 = vector.broadcast %cst_5 : f32 to vector<8x128xf32>
    %8 = arith.maximumf %6, %7 : vector<8x128xf32>
    %9 = arith.truncf %8 : vector<8x128xf32> to vector<8x128xbf16>
    %c0_6 = arith.constant 0 : index
    %c0_7 = arith.constant 0 : index
    %10 = vector.load %arg3[%c0_6, %c0_7] : memref<128x128xbf16, #tpu.memory_space<vmem>>, vector<128x128xbf16>
    %cst_8 = arith.constant dense<0.000000e+00> : vector<8x128xf32>
    %11 = tpu.matmul %9, %10, %cst_8 {dimension_numbers = #tpu.dot_dimension_numbers<[1], [0], [0], [1], [0, 0, 1, 1], [], []>} : vector<8x128xbf16>, vector<128x128xbf16>, vector<8x128xf32> -> vector<8x128xf32>
    %c0_9 = arith.constant 0 : index
    %c0_10 = arith.constant 0 : index
    %12 = vector.load %arg4[%c0_9, %c0_10] : memref<1x128xf32, #tpu.memory_space<vmem>>, vector<1x128xf32>
    %13 = vector.broadcast %12 : vector<1x128xf32> to vector<8x128xf32>
    %14 = arith.addf %11, %13 : vector<8x128xf32>
    %c0_11 = arith.constant 0 : index
    %c0_12 = arith.constant 0 : index
    %15 = vector.load %arg5[%c0_11, %c0_12] : memref<8x128xf32, #tpu.memory_space<vmem>>, vector<8x128xf32>
    tpu.vector_store %arg5[%c0_11, %c0_12], %14 {strides = array<i32>} : memref<8x128xf32, #tpu.memory_space<vmem>>, vector<8x128xf32>,
    return
  }
}

</mosaic_0001>

<bundles_post_ra>
// kernel: tpu_custom_call.1
= control target key start
LH: loop header
LB: loop body
LE: loop exit
PB: predicated region body
PF: predicated region fallthrough
CT: control target
= control target key end

     0   :  { %10 = vsyncpa [#allocation3], 0  ;;  %s423_s0 = inlined_call_operand.hbm [shape: f32[8,32], index: 0, kind: input, shape index: {}]   ;;  %s424_s1 = inlined_call_operand.hbm [shape: bf16[32,128], index: 1, kind: input, shape index: {}]   ;;  %s425_s2 = inlined_call_operand.vmem [shape: f32[1,128], index: 2, kind: input, shape index: {}]   ;;  %s426_s3 = inlined_call_operand.hbm [shape: bf16[128,128], index: 3, kind: input, shape index: {}]   ;;  %s427_s4 = inlined_call_operand.vmem [shape: f32[1,128], index: 4, kind: input, shape index: {}]   ;;  %s428_s5 = inlined_call_operand.hbm [shape: f32[8,128], index: 5, kind: output, shape index: {}]  }
   0x1   :  { %11 = vsyncpa [#allocation6], 0  ;;  %s28_s20 = sshll.u32 %s424_s1, 4  ;;  %s29_s20 = int_to_ptr.hbm [resolvable:$true] %s28_s20 }
   0x2   :  { %12 = vsyncpa [#allocation4], 0  ;;  %s369_s21 = smov [#allocation5]   ;;  %s18_s25 = sshll.u32 %s423_s0, 4  ;;  %s19_s25 = int_to_ptr.hbm [resolvable:$true] %s18_s25 }
   0x3   :  { %s30_s22 = sshll.u32 %s369_s21, 4  ;;  %s370_s26 = smov 64   ;;  %s31_s22 = int_to_ptr.vmem [resolvable:$true] %s30_s22 }
   0x4   :  { %s371_s27 = smov 4   ;;  %s372_s28 = smov [#allocation2]  }
   0x5   :  { %36 = dma.hbm_to_vmem [thread:$0]  %s29_s20, 256, %s31_s22, [#allocation6], %s370_s26, %s370_s26, %s371_s27  }
   0x6   :  { %s20_s29 = sshll.u32 %s372_s28, 4  ;;  %s43_s7 = sshll.u32 %s426_s3, 4  ;;  %s21_s29 = int_to_ptr.vmem [resolvable:$true] %s20_s29  ;;  %s44_s7 = int_to_ptr.hbm [resolvable:$true] %s43_s7 }
   0x7   :  { %23 = dma.hbm_to_vmem [thread:$0]  %s19_s25, 128, %s21_s29, [#allocation3]  }
   0x8   :  { %s373_s1 = smov [#allocation7]  }
   0x9   :  { %s45_s8 = sshll.u32 %s373_s1, 4  ;;  %s46_s8 = int_to_ptr.vmem [resolvable:$true] %s45_s8 }
   0xa   :  { %51 = dma.hbm_to_vmem [thread:$0]  %s44_s7, 1024, %s46_s8, [#allocation6], %s370_s26, %s370_s26, %s371_s27  }
   0xb   :  { %363 = dma.done.wait [#allocation3], 128  }
   0xc   :  { %364 = vsyncadd [#allocation3], 4294967168 }
   0xd   :  { %365 = dma.done.wait [#allocation6], 1280  }
   0xe   :  { %366 = vsyncadd [#allocation6], 4294966016  ;;  %v250_v0 = vld [vmem:[#allocation5 + $0x8] sm:$0xff]  ;;  %v249_v2 = vld [vmem:[#allocation5] sm:$0xff]  ;;  %vm89_vm0 = vcmask 261120   ;;  %s374_s11 = smov [#allocation8]  }
   0xf   :  { %v258_v1 = vld [vmem:[#allocation7 + $0x38] sm:$0xff]  ;;  %99 = vmatpush.bf16.msra.mxu0 %v250_v0  ;;  %v67_v3 = vld [vmem:[#allocation2] sm:$0xff]  ;;  %v257_v4 = vld [vmem:[#allocation7 + $0x30] sm:$0xff]  ;;  %s195_s12 = sshll.u32 %s374_s11, 4  ;;  %s197_s15 = sshll.u32 %s428_s5, 4  ;;  %s196_s12 = int_to_ptr.vmem [resolvable:$true] %s195_s12  ;;  %s198_s15 = int_to_ptr.hbm [resolvable:$true] %s197_s15 }
  0x10   :  { %176 = vmatpush.bf16.msra.mxu1 %v258_v1  ;;  %v68_v5 = vpack.c.bf16 %v67_v3, %v67_v3  ;;  %v256_v6 = vld [vmem:[#allocation7 + $0x28] sm:$0xff]  ;;  %v255_v7 = vld [vmem:[#allocation7 + $0x20] sm:$0xff]  ;;  %v254_v8 = vld [vmem:[#allocation7 + $0x18] sm:$0xff] }
  0x11   :  { %v253_v9 = vld [vmem:[#allocation7 + $0x10] sm:$0xff]  ;;  %v252_v10 = vld [vmem:[#allocation7 + $0x8] sm:$0xff]  ;;  %v251_v11 = vld [vmem:[#allocation7] sm:$0xff] }
  0x12   :  { %v265_v12 = vld [vmem:[%s425_s2] ss:$0 sm:$0xff] }
  0x13   :  { %100 = vmatpush.bf16.msra.mxu0 %v249_v2  ;;  %v266_v18 = vld [vmem:[%s427_s4] ss:$0 sm:$0xff] }
  0x14   :  { %177 = vmatpush.bf16.msra.mxu1 %v257_v4 }
  0x16   :  { %216 = vmatmul.msk.bf16.vlgmr.msra.gmra.mxu0 %vm89_vm0, %v68_v5 }
  0x18   :  { %178 = vmatpush.bf16.msra.mxu1 %v256_v6 }
  0x1c   :  { %179 = vmatpush.bf16.msra.mxu1 %v255_v7 }
  0x20   :  { %180 = vmatpush.bf16.msra.mxu1 %v254_v8 }
  0x24   :  { %181 = vmatpush.bf16.msra.mxu1 %v253_v9 }
  0x28   :  { %182 = vmatpush.bf16.msra.mxu1 %v252_v10 }
  0x2c   :  { %183 = vmatpush.bf16.msra.mxu1 %v251_v11 }
  0x93   :  { %v102_v13 = vpop.f32.mrf.mxu0 }
  0x94   :  { %v103_v14 = vadd.f32 %v265_v12, %v102_v13 }
  0x96   :  { %v106_v15 = vmax.f32 %v103_v14, 0.0 }
  0x98   :  { %v107_v16 = vpack.c.bf16 %v106_v15, %v106_v15 }
  0x9a   :  { %184 = vmatmul.bf16.vlgmr.msra.gmra.mxu1 %v107_v16 }
  0x9b   :  { %v104_v17 = vpop.f32.mrf.mxu0 }
 0x117   :  { %v185_v19 = vpop.f32.mrf.mxu1 }
 0x118   :  { %v186_v20 = vadd.f32 %v266_v18, %v185_v19 }
 0x11a   :  { %189 = vst [vmem:[#allocation8] sm:$0xff] %v186_v20 }
 0x11b   :  { %200 = dma.vmem_to_hbm [thread:$0]  %s196_s12, 128, %s198_s15, [#allocation4]  }
 0x11f   :  { %v187_v21 = vpop.f32.mrf.mxu1 }
 0x120   :  { %367 = dma.done.wait [#allocation4], 128  }
 0x121   :  { %368 = vsyncadd [#allocation4], 4294967168 }
 0x122   :  { %205 = vsyncpa [#allocation3], 1 }
 0x123   :  { %206 = vsyncpa [#allocation6], 1 }
 0x124   :  { %207 = vsyncpa [#allocation4], 1 }

</bundles_post_ra>
